<compile_context>
chip_gen: v7x
topology: tpu7x:2x2x1
jax: 0.10.0
libtpu: 0.0.40
codegen_flags: <defaults>
</compile_context>

<pallas_src>
import functools

import jax
import jax.numpy as jnp
from jax.experimental import pallas as pl
from jax.experimental.pallas import tpu as pltpu


# ----------------------------------------------------------------------------
# Shared in-kernel conv: 9-tap gather (shifted slices of the flattened padded
# image) feeding a per-output-channel MAC, result [C_out, Ho*Wp] (f32).
# Column m = i*Wp + j is the conv output at pixel (i, j); columns with j >= Wo
# are junk from the row-flattening trick and are masked / dropped by callers.
# ----------------------------------------------------------------------------
def _conv_rows(x_ref, w_ref, *, k, Wp, L):
    xv = x_ref[0].astype(jnp.float32)        # [1, Lp]
    wv = w_ref[...].astype(jnp.float32)      # [C_out, k*k]
    c_out = wv.shape[0]
    y = jnp.zeros((c_out, L), dtype=jnp.float32)
    for dh in range(k):
        for dw in range(k):
            off = dh * Wp + dw
            tap = xv[:, off:off + L]                         # [1, L]
            w_col = wv[:, dh * k + dw:dh * k + dw + 1]       # [C_out, 1]
            y = y + w_col * tap                              # broadcast MAC
    return y


# ----------------------------------------------------------------------------
# Pass 1: per-image partial statistics (mean + centered sum of squares).
# ----------------------------------------------------------------------------
def _stats_kernel(x_ref, w_ref, mask_ref, mean_ref, ssq_ref, *, k, Wp, L, n_valid):
    y = _conv_rows(x_ref, w_ref, k=k, Wp=Wp, L=L)            # [C_out, L]
    m = mask_ref[0]                                          # [1, L] (1 = valid col)
    inv_n = jnp.float32(1.0 / n_valid)
    s = jnp.sum(y * m, axis=1, keepdims=True)                # [C_out, 1]
    mu = s * inv_n
    d = (y - mu) * m
    ssq = jnp.sum(d * d, axis=1, keepdims=True)              # [C_out, 1]
    mean_ref[0] = mu
    ssq_ref[0] = ssq


# ----------------------------------------------------------------------------
# Pass 2: recompute conv and apply folded BN affine; lane-dense [C_out, Ho*Wo]
# output block per image (pad columns dropped row-by-row inside the kernel).
# ----------------------------------------------------------------------------
def _norm_kernel(x_ref, w_ref, scale_ref, shift_ref, o_ref, *, k, Wp, Wo, Ho, L):
    y = _conv_rows(x_ref, w_ref, k=k, Wp=Wp, L=L)            # [C_out, L]
    y = y * scale_ref[...] + shift_ref[...]                  # [C_out,1] broadcast
    for i in range(Ho):
        o_ref[0, :, i * Wo:(i + 1) * Wo] = (
            y[:, i * Wp:i * Wp + Wo].astype(o_ref.dtype))


# ----------------------------------------------------------------------------
# Glue: C4 filter expansion and the public forward.
# ----------------------------------------------------------------------------
def expand_c4_regular_filters(w_base):
    """w_base: [n_channels, k, k] -> [n_channels*4, k, k] (trivial -> C4 regular)."""
    n_channels, k, _ = w_base.shape
    filters = []
    for c in range(n_channels):
        for g in range(4):
            filters.append(jnp.rot90(w_base[c], k=g))
    return jnp.stack(filters, axis=0)


def gon_r2_conv_block(x_nchw, w_base, gamma_field, beta_field, *, N=4, padding=1,
                      eps=1e-5, compute_dtype=jnp.float32):
    """Forward of GonR2ConvBlock (R2Conv + InnerBatchNorm), Pallas hot path.

    x_nchw      : [B, 1, H, W]         (trivial input repr -> 1 channel)
    w_base      : [n_channels, k, k]   base filter per output field
    gamma_field : [n_channels]         per-field BN scale
    beta_field  : [n_channels]         per-field BN bias
    returns     : [B, n_channels*N, Ho, Wo]  (NCHW, like the torch module)
    """
    assert N == 4, "exact filter expansion implemented for the C4 group"
    B, Cin, H, W = x_nchw.shape
    assert Cin == 1
    n_channels, k, _ = w_base.shape
    C_out = n_channels * N

    Hp, Wp = H + 2 * padding, W + 2 * padding
    Ho, Wo = Hp - k + 1, Wp - k + 1
    L = Ho * Wp                    # conv columns computed per image (incl. pad cols)
    n_valid = Ho * Wo              # valid output pixels per image
    Lp = Hp * Wp + (k - 1)         # flat length (+ tail) so every tap slice fits

    # Expanded C4-equivariant filter bank in matmul/MAC layout.
    w_full = expand_c4_regular_filters(w_base)                      # [C_out, k, k]
    w_mat = w_full.reshape(C_out, k * k).astype(compute_dtype)      # [C_out, k*k]

    # Pad + flatten the single trivial-repr channel (free reshapes; no im2col).
    xp = jnp.pad(x_nchw[:, 0], ((0, 0), (padding, padding), (padding, padding)))
    xflat = xp.reshape(B, 1, Hp * Wp)
    xflat = jnp.pad(xflat, ((0, 0), (0, 0), (0, k - 1))).astype(compute_dtype)

    # Validity mask over the Ho*Wp conv columns (column j within a row < Wo).
    col = jnp.arange(L, dtype=jnp.int32) % Wp
    mask = (col < Wo).astype(jnp.float32).reshape(1, 1, L)

    # ------------------ pass 1: per-image partial statistics -----------------
    stats_kernel = functools.partial(_stats_kernel, k=k, Wp=Wp, L=L, n_valid=n_valid)
    mean_t, ssq_t = pl.pallas_call(
        stats_kernel,
        out_shape=(jax.ShapeDtypeStruct((B, C_out, 1), jnp.float32),
                   jax.ShapeDtypeStruct((B, C_out, 1), jnp.float32)),
        grid_spec=pltpu.PrefetchScalarGridSpec(
            num_scalar_prefetch=0,
            grid=(B,),
            in_specs=[
                pl.BlockSpec((1, 1, Lp), lambda b: (b, 0, 0)),        # image
                pl.BlockSpec((C_out, k * k), lambda b: (0, 0)),        # weights (resident)
                pl.BlockSpec((1, 1, L), lambda b: (0, 0, 0)),          # valid-col mask
            ],
            out_specs=(
                pl.BlockSpec((1, C_out, 1), lambda b: (b, 0, 0)),
                pl.BlockSpec((1, C_out, 1), lambda b: (b, 0, 0)),
            )),
        compiler_params=pltpu.CompilerParams(dimension_semantics=("parallel",)),
    )(xflat, w_mat, mask)

    # Chan-style combine of per-image/per-copy chunks -> per-field mean & biased var.
    mean_t = mean_t.reshape(B, n_channels, N)
    ssq_t = ssq_t.reshape(B, n_channels, N)
    field_mean = jnp.mean(mean_t, axis=(0, 2))                              # [n_ch]
    dev = mean_t - field_mean[None, :, None]
    total_ssq = jnp.sum(ssq_t, axis=(0, 2)) + n_valid * jnp.sum(dev * dev, axis=(0, 2))
    field_var = total_ssq / jnp.float32(B * N * n_valid)                    # biased

    inv_std = jax.lax.rsqrt(field_var + jnp.float32(eps))
    scale_f = gamma_field.astype(jnp.float32) * inv_std
    shift_f = beta_field.astype(jnp.float32) - field_mean * scale_f
    scale_c = jnp.repeat(scale_f, N).reshape(C_out, 1)                      # per channel
    shift_c = jnp.repeat(shift_f, N).reshape(C_out, 1)

    # ------------------ pass 2: conv recompute + normalize -------------------
    norm_kernel = functools.partial(_norm_kernel, k=k, Wp=Wp, Wo=Wo, Ho=Ho, L=L)
    out = pl.pallas_call(
        norm_kernel,
        out_shape=jax.ShapeDtypeStruct((B, C_out, Ho * Wo), jnp.float32),
        grid_spec=pltpu.PrefetchScalarGridSpec(
            num_scalar_prefetch=0,
            grid=(B,),
            in_specs=[
                pl.BlockSpec((1, 1, Lp), lambda b: (b, 0, 0)),        # image
                pl.BlockSpec((C_out, k * k), lambda b: (0, 0)),        # weights (resident)
                pl.BlockSpec((C_out, 1), lambda b: (0, 0)),            # folded scale
                pl.BlockSpec((C_out, 1), lambda b: (0, 0)),            # folded shift
            ],
            out_specs=pl.BlockSpec((1, C_out, Ho * Wo), lambda b: (b, 0, 0))),
        compiler_params=pltpu.CompilerParams(dimension_semantics=("parallel",)),
    )(xflat, w_mat, scale_c, shift_c)

    # [B, C_out, Ho*Wo] is already NCHW-contiguous: final reshape is free.
    return out.reshape(B, C_out, Ho, Wo)


# ----------------------------------------------------------------------------
# Pure-JAX reference (conv + inner batch norm) for verification.
# ----------------------------------------------------------------------------
def reference(x_nchw, w_base, gamma_field, beta_field, *, N, padding=1, eps=1e-5):
    w_full = expand_c4_regular_filters(w_base)                  # [C_out, k, k]
    y = jax.lax.conv_general_dilated(
        x_nchw, w_full[:, None, :, :], window_strides=(1, 1),
        padding=[(padding, padding), (padding, padding)],
        dimension_numbers=("NCHW", "OIHW", "NCHW"))
    B, C, H, W = y.shape
    yf = y.reshape(B, C // N, N, H, W)
    mean = yf.mean(axis=(0, 2, 3, 4), keepdims=True)
    var = yf.var(axis=(0, 2, 3, 4), keepdims=True)
    out = (yf - mean) / jnp.sqrt(var + eps)
    out = out * gamma_field[None, :, None, None, None] + \
        beta_field[None, :, None, None, None]
    return out.reshape(B, C, H, W)


if __name__ == "__main__":
    # Small deterministic config consistent with the module:
    # N=4, n_channels=4, kernel_size=3, padding=1, bias=False, nonlinearity=None.
    N = 4
    n_channels = 4
    kernel_size = 3
    padding = 1
    B, H, W = 2, 16, 16

    key = jax.random.PRNGKey(0)
    kx, kw = jax.random.split(key)
    x = jax.random.normal(kx, (B, 1, H, W), dtype=jnp.float32)
    w_base = 0.1 * jax.random.normal(
        kw, (n_channels, kernel_size, kernel_size), dtype=jnp.float32)
    gamma_field = 1.0 + 0.1 * jnp.arange(n_channels, dtype=jnp.float32)
    beta_field = 0.05 * jnp.arange(n_channels, dtype=jnp.float32)

    ref = reference(x, w_base, gamma_field, beta_field, N=N, padding=padding)

    # f32 path: tight tolerance against the f32 reference.
    out = gon_r2_conv_block(x, w_base, gamma_field, beta_field, N=N,
                            padding=padding, compute_dtype=jnp.float32)
    out = jax.block_until_ready(out)
    assert out.shape == (B, n_channels * N, H, W)
    assert jnp.allclose(out, ref, rtol=1e-3, atol=1e-3), \
        f"f32 max err {jnp.max(jnp.abs(out - ref))}"

    # bf16 input path (halved input DMA bytes; f32 in-kernel math): looser tol.
    out_bf16 = gon_r2_conv_block(x, w_base, gamma_field, beta_field, N=N,
                                 padding=padding, compute_dtype=jnp.bfloat16)
    out_bf16 = jax.block_until_ready(out_bf16)
    assert jnp.allclose(out_bf16, ref, rtol=5e-2, atol=5e-2), \
        f"bf16 max err {jnp.max(jnp.abs(out_bf16 - ref))}"

    print("KERNEL_OK")
</pallas_src>

<mosaic_0001>
module attributes {stable_mosaic.version = 11 : i64} {
  func.func @_stats_kernel(%arg0: i32, %arg1: memref<1x1x326xf32, #tpu.memory_space<vmem>>, %arg2: memref<16x9xf32, #tpu.memory_space<vmem>>, %arg3: memref<1x1x288xf32, #tpu.memory_space<vmem>>, %arg4: memref<1x16x1xf32, #tpu.memory_space<vmem>>, %arg5: memref<1x16x1xf32, #tpu.memory_space<vmem>>) attributes {dimension_semantics = [#tpu.dimension_semantics<parallel>], iteration_bounds = array<i64: 2>, scalar_prefetch = 0 : i64, scratch_operands = 0 : i64, tpu.core_type = #tpu.core_type<tc>, window_params = [{transform_indices = @transform_0, window_bounds = array<i64: 1, 1, 326>}, {pipeline_mode = #tpu.pipeline_mode<synchronous>, transform_indices = @transform_1, window_bounds = array<i64: 16, 9>}, {pipeline_mode = #tpu.pipeline_mode<synchronous>, transform_indices = @transform_2, window_bounds = array<i64: 1, 1, 288>}, {transform_indices = @transform_3, window_bounds = array<i64: 1, 16, 1>}, {transform_indices = @transform_4, window_bounds = array<i64: 1, 16, 1>}]} {
    %c0 = arith.constant 0 : index
    %c0_0 = arith.constant 0 : index
    %c0_1 = arith.constant 0 : index
    %0 = vector.load %arg1[%c0, %c0_0, %c0_1] : memref<1x1x326xf32, #tpu.memory_space<vmem>>, vector<1x1x326xf32>
    %1 = vector.shape_cast %0 : vector<1x1x326xf32> to vector<1x326xf32>
    %c0_2 = arith.constant 0 : index
    %c0_3 = arith.constant 0 : index
    %2 = vector.load %arg2[%c0_2, %c0_3] : memref<16x9xf32, #tpu.memory_space<vmem>>, vector<16x9xf32>
    %cst = arith.constant 0.000000e+00 : f32
    %3 = vector.broadcast %cst : f32 to vector<16x288xf32>
    %4 = vector.extract_strided_slice %1 {offsets = [0, 0], sizes = [1, 288], strides = [1, 1]} : vector<1x326xf32> to vector<1x288xf32>
    %5 = vector.extract_strided_slice %2 {offsets = [0, 0], sizes = [16, 1], strides = [1, 1]} : vector<16x9xf32> to vector<16x1xf32>
    %6 = vector.broadcast %5 : vector<16x1xf32> to vector<16x288xf32>
    %7 = vector.broadcast %4 : vector<1x288xf32> to vector<16x288xf32>
    %8 = arith.mulf %6, %7 : vector<16x288xf32>
    %9 = arith.addf %3, %8 : vector<16x288xf32>
    %10 = vector.extract_strided_slice %1 {offsets = [0, 1], sizes = [1, 288], strides = [1, 1]} : vector<1x326xf32> to vector<1x288xf32>
    %11 = vector.extract_strided_slice %2 {offsets = [0, 1], sizes = [16, 1], strides = [1, 1]} : vector<16x9xf32> to vector<16x1xf32>
    %12 = vector.broadcast %11 : vector<16x1xf32> to vector<16x288xf32>
    %13 = vector.broadcast %10 : vector<1x288xf32> to vector<16x288xf32>
    %14 = arith.mulf %12, %13 : vector<16x288xf32>
    %15 = arith.addf %9, %14 : vector<16x288xf32>
    %16 = vector.extract_strided_slice %1 {offsets = [0, 2], sizes = [1, 288], strides = [1, 1]} : vector<1x326xf32> to vector<1x288xf32>
    %17 = vector.extract_strided_slice %2 {offsets = [0, 2], sizes = [16, 1], strides = [1, 1]} : vector<16x9xf32> to vector<16x1xf32>
    %18 = vector.broadcast %17 : vector<16x1xf32> to vector<16x288xf32>
    %19 = vector.broadcast %16 : vector<1x288xf32> to vector<16x288xf32>
    %20 = arith.mulf %18, %19 : vector<16x288xf32>
    %21 = arith.addf %15, %20 : vector<16x288xf32>
    %22 = vector.extract_strided_slice %1 {offsets = [0, 18], sizes = [1, 288], strides = [1, 1]} : vector<1x326xf32> to vector<1x288xf32>
    %23 = vector.extract_strided_slice %2 {offsets = [0, 3], sizes = [16, 1], strides = [1, 1]} : vector<16x9xf32> to vector<16x1xf32>
    %24 = vector.broadcast %23 : vector<16x1xf32> to vector<16x288xf32>
    %25 = vector.broadcast %22 : vector<1x288xf32> to vector<16x288xf32>
    %26 = arith.mulf %24, %25 : vector<16x288xf32>
    %27 = arith.addf %21, %26 : vector<16x288xf32>
    %28 = vector.extract_strided_slice %1 {offsets = [0, 19], sizes = [1, 288], strides = [1, 1]} : vector<1x326xf32> to vector<1x288xf32>
    %29 = vector.extract_strided_slice %2 {offsets = [0, 4], sizes = [16, 1], strides = [1, 1]} : vector<16x9xf32> to vector<16x1xf32>
    %30 = vector.broadcast %29 : vector<16x1xf32> to vector<16x288xf32>
    %31 = vector.broadcast %28 : vector<1x288xf32> to vector<16x288xf32>
    %32 = arith.mulf %30, %31 : vector<16x288xf32>
    %33 = arith.addf %27, %32 : vector<16x288xf32>
    %34 = vector.extract_strided_slice %1 {offsets = [0, 20], sizes = [1, 288], strides = [1, 1]} : vector<1x326xf32> to vector<1x288xf32>
    %35 = vector.extract_strided_slice %2 {offsets = [0, 5], sizes = [16, 1], strides = [1, 1]} : vector<16x9xf32> to vector<16x1xf32>
    %36 = vector.broadcast %35 : vector<16x1xf32> to vector<16x288xf32>
    %37 = vector.broadcast %34 : vector<1x288xf32> to vector<16x288xf32>
    %38 = arith.mulf %36, %37 : vector<16x288xf32>
    %39 = arith.addf %33, %38 : vector<16x288xf32>
    %40 = vector.extract_strided_slice %1 {offsets = [0, 36], sizes = [1, 288], strides = [1, 1]} : vector<1x326xf32> to vector<1x288xf32>
    %41 = vector.extract_strided_slice %2 {offsets = [0, 6], sizes = [16, 1], strides = [1, 1]} : vector<16x9xf32> to vector<16x1xf32>
    %42 = vector.broadcast %41 : vector<16x1xf32> to vector<16x288xf32>
    %43 = vector.broadcast %40 : vector<1x288xf32> to vector<16x288xf32>
    %44 = arith.mulf %42, %43 : vector<16x288xf32>
    %45 = arith.addf %39, %44 : vector<16x288xf32>
    %46 = vector.extract_strided_slice %1 {offsets = [0, 37], sizes = [1, 288], strides = [1, 1]} : vector<1x326xf32> to vector<1x288xf32>
    %47 = vector.extract_strided_slice %2 {offsets = [0, 7], sizes = [16, 1], strides = [1, 1]} : vector<16x9xf32> to vector<16x1xf32>
    %48 = vector.broadcast %47 : vector<16x1xf32> to vector<16x288xf32>
    %49 = vector.broadcast %46 : vector<1x288xf32> to vector<16x288xf32>
    %50 = arith.mulf %48, %49 : vector<16x288xf32>
    %51 = arith.addf %45, %50 : vector<16x288xf32>
    %52 = vector.extract_strided_slice %1 {offsets = [0, 38], sizes = [1, 288], strides = [1, 1]} : vector<1x326xf32> to vector<1x288xf32>
    %53 = vector.extract_strided_slice %2 {offsets = [0, 8], sizes = [16, 1], strides = [1, 1]} : vector<16x9xf32> to vector<16x1xf32>
    %54 = vector.broadcast %53 : vector<16x1xf32> to vector<16x288xf32>
    %55 = vector.broadcast %52 : vector<1x288xf32> to vector<16x288xf32>
    %56 = arith.mulf %54, %55 : vector<16x288xf32>
    %57 = arith.addf %51, %56 : vector<16x288xf32>
    %c0_4 = arith.constant 0 : index
    %c0_5 = arith.constant 0 : index
    %c0_6 = arith.constant 0 : index
    %58 = vector.load %arg3[%c0_4, %c0_5, %c0_6] : memref<1x1x288xf32, #tpu.memory_space<vmem>>, vector<1x1x288xf32>
    %59 = vector.shape_cast %58 : vector<1x1x288xf32> to vector<1x288xf32>
    %60 = vector.broadcast %59 : vector<1x288xf32> to vector<16x288xf32>
    %61 = arith.mulf %57, %60 : vector<16x288xf32>
    %cst_7 = arith.constant dense<0.000000e+00> : vector<16xf32>
    %62 = vector.multi_reduction <add>, %61, %cst_7 [1] : vector<16x288xf32> to vector<16xf32>
    %63 = vector.shape_cast %62 : vector<16xf32> to vector<16x1xf32>
    %cst_8 = arith.constant 3.906250e-03 : f32
    %64 = vector.broadcast %cst_8 : f32 to vector<16x1xf32>
    %65 = arith.mulf %63, %64 : vector<16x1xf32>
    %66 = vector.broadcast %65 : vector<16x1xf32> to vector<16x288xf32>
    %67 = arith.subf %57, %66 : vector<16x288xf32>
    %68 = vector.broadcast %59 : vector<1x288xf32> to vector<16x288xf32>
    %69 = arith.mulf %67, %68 : vector<16x288xf32>
    %70 = arith.mulf %69, %69 : vector<16x288xf32>
    %cst_9 = arith.constant dense<0.000000e+00> : vector<16xf32>
    %71 = vector.multi_reduction <add>, %70, %cst_9 [1] : vector<16x288xf32> to vector<16xf32>
    %72 = vector.shape_cast %71 : vector<16xf32> to vector<16x1xf32>
    %c0_10 = arith.constant 0 : index
    %c0_11 = arith.constant 0 : index
    %c0_12 = arith.constant 0 : index
    %73 = vector.load %arg4[%c0_10, %c0_11, %c0_12] : memref<1x16x1xf32, #tpu.memory_space<vmem>>, vector<1x16x1xf32>
    %74 = vector.shape_cast %73 : vector<1x16x1xf32> to vector<16x1xf32>
    %75 = vector.shape_cast %65 : vector<16x1xf32> to vector<1x16x1xf32>
    tpu.vector_store %arg4[%c0_10, %c0_11, %c0_12], %75 {strides = array<i32>} : memref<1x16x1xf32, #tpu.memory_space<vmem>>, vector<1x16x1xf32>,
    %c0_13 = arith.constant 0 : index
    %c0_14 = arith.constant 0 : index
    %c0_15 = arith.constant 0 : index
    %76 = vector.load %arg5[%c0_13, %c0_14, %c0_15] : memref<1x16x1xf32, #tpu.memory_space<vmem>>, vector<1x16x1xf32>
    %77 = vector.shape_cast %76 : vector<1x16x1xf32> to vector<16x1xf32>
    %78 = vector.shape_cast %72 : vector<16x1xf32> to vector<1x16x1xf32>
    tpu.vector_store %arg5[%c0_13, %c0_14, %c0_15], %78 {strides = array<i32>} : memref<1x16x1xf32, #tpu.memory_space<vmem>>, vector<1x16x1xf32>,
    return
  }
  func.func @transform_0(%arg0: i32) -> (i32, i32, i32) {
    %c0_i32 = arith.constant 0 : i32
    %c0_i32_0 = arith.constant 0 : i32
    %c0_i32_1 = arith.constant 0 : i32
    return %arg0, %c0_i32, %c0_i32_0 : i32, i32, i32
  }
  func.func @transform_1(%arg0: i32) -> (i32, i32) {
    %c0_i32 = arith.constant 0 : i32
    %c0_i32_0 = arith.constant 0 : i32
    %c0_i32_1 = arith.constant 0 : i32
    return %c0_i32, %c0_i32_0 : i32, i32
  }
  func.func @transform_2(%arg0: i32) -> (i32, i32, i32) {
    %c0_i32 = arith.constant 0 : i32
    %c0_i32_0 = arith.constant 0 : i32
    %c0_i32_1 = arith.constant 0 : i32
    %c0_i32_2 = arith.constant 0 : i32
    return %c0_i32, %c0_i32_0, %c0_i32_1 : i32, i32, i32
  }
  func.func @transform_3(%arg0: i32) -> (i32, i32, i32) {
    %c0_i32 = arith.constant 0 : i32
    %c0_i32_0 = arith.constant 0 : i32
    %c0_i32_1 = arith.constant 0 : i32
    return %arg0, %c0_i32, %c0_i32_0 : i32, i32, i32
  }
  func.func @transform_4(%arg0: i32) -> (i32, i32, i32) {
    %c0_i32 = arith.constant 0 : i32
    %c0_i32_0 = arith.constant 0 : i32
    %c0_i32_1 = arith.constant 0 : i32
    return %arg0, %c0_i32, %c0_i32_0 : i32, i32, i32
  }
}

</mosaic_0001>

<bundles_post_ra>
// kernel: tpu_custom_call.1
= control target key start
LH: loop header
LB: loop body
LE: loop exit
PB: predicated region body
PF: predicated region fallthrough
CT: control target
= control target key end

     0   :  { %10 = vsyncpa [#allocation3], 0  ;;  %s1412_s0 = inlined_call_operand.hbm [shape: f32[2,1,326], index: 0, kind: input, shape index: {}]   ;;  %s1413_s1 = inlined_call_operand.hbm [shape: f32[16,9], index: 1, kind: input, shape index: {}]   ;;  %s1414_s2 = inlined_call_operand.vmem [shape: f32[1,1,288], index: 2, kind: input, shape index: {}]   ;;  %s1415_s3 = inlined_call_operand.vmem [shape: f32[2,16,1], index: 3, kind: output, shape index: {0}]   ;;  %s1416_s4 = inlined_call_operand.vmem [shape: f32[2,16,1], index: 4, kind: output, shape index: {1}]  }
   0x1   :  { %12 = vsyncpa [#allocation3 + $0x1], 0 }
   0x2   :  { %13 = vsyncpa [#allocation5], 0  ;;  %s1102_s15 = smov 0   ;;  %s1104_s16 = smov 0  }
   0x3   :  { %s1106_s17 = smov 0   ;;  %s1108_s18 = smov 0  }
   0x4 LB: > { %s1121_s19 = sadd.s32 4294967295, %s1054_s18   ;;  %p39_p0 = scmp.ne.s32.totalorder %s1046_s16, %s1042_s15  ;;  %s1054_s18 = sphi %s1108_s18, %s1431_s18   ;;  %s1050_s17 = sphi %s1106_s17, %s1430_s17   ;;  %s1046_s16 = sphi %s1104_s16, %s1429_s16   ;;  %s1042_s15 = sphi %s1102_s15, %s1428_s15  }
   0x5   : > { %p1417_p1 = scmp.eq.s32.totalorder %s1121_s19, 0  ;;  %p857_p2 = scmp.ge.s32.totalorder %s1054_s18, 1 }
   0x6   : > { %p144_p3 = scmp.lt.s32.totalorder %s1054_s18, 3  ;;  %s1056_s22 = smov [#allocation4]  }
   0x7   : > { %p1129_p4 = por %p1417_p1, %p39_p0  ;;  %s156_s23 = sshll.u32 %s1056_s22, 4  ;;  %s157_s23 = int_to_ptr.vmem [resolvable:$true] %s156_s23 }
   0x8   : > { %p1133_p5 = pnand %p857_p2, %p144_p3  ;;  %s1146_s25 = sadd.s32 1, %s1054_s18  }
   0x9   : > { %s1420_s20 = scalar_select %p1129_p4, 1, 0 }
   0xa   : > { %s1421_s21 = scalar_select %p1133_p5, 1, 0 }
   0xb   : > { %p880_p6 = pneg %p1133_p5  ;;  %s26_s26 = sadd.s32 1, %s1050_s17 }
   0xc   : > { %s23_s27 = ssub.s32 %s1054_s18, %s1146_s25  ;;  %s958_s30 = scalar_lea.hbm %s1413_s1, 256 }
   0xd   : > { %p1141_p7 = pnand %p880_p6, %p1417_p1  ;;  %p959_p8 = scmp.ne.s32.totalorder %s1413_s1, %s958_s30 }
   0xe   : > { %p965_p12 = scmp.lt.u32.totalorder %s958_s30, %s1413_s1 }
   0xf   : > { %p960_p9 = pneg %p1141_p7 }
  0x11   : > { %p961_p10 = pnand %p960_p9, %p959_p8 }
  0x13   : > { %p962_p11 = pneg %p961_p10 }
  0x15   : > { %p967_p13 = pnand %p965_p12, %p962_p11 }
  0x17   : > { %970 = shalt.err (!%p967_p13)
}
  0x18   : > { %s971_s9 = scalar_lea.vmem %s157_s23, 256  ;;  %p979_p6 = scmp.lt.s32.totalorder %s157_s23, %s157_s23 }
  0x19   : > { %p972_p0 = scmp.ne.s32.totalorder %s157_s23, %s971_s9  ;;  %p980_p1 = scmp.lt.s32.totalorder %s971_s9, %s971_s9 }
  0x1b   : > { %p974_p2 = pnand %p972_p0, %p960_p9  ;;  %p981_p4 = por %p980_p1, %p979_p6 }
  0x1d   : > { %p975_p3 = pneg %p974_p2 }
  0x1f   : > { %p982_p5 = pnand %p981_p4, %p975_p3 }
  0x21   : > { %985 = shalt.err (!%p982_p5)
}
  0x22   : > { %s1057_s10 = smov 128   ;;  %s1058_s11 = smov 8  }
  0x23   : > { %883 = dma.hbm_to_vmem [thread:$0]  (!%p1141_p7), %s1413_s1, 256, %s157_s23, [#allocation5], %s1057_s10, %s1057_s10, %s1058_s11  }
  0x24   : > { %p24_p8 = scmp.eq.s32.totalorder %s23_s27, 0  ;;  %p33_p9 = scmp.ne.s32.totalorder %s1050_s17, %s1046_s16 }
  0x25   : > { %p34_p1 = scmp.eq.s32.totalorder %s1054_s18, 0  ;;  %p889_p4 = scmp.lt.s32.totalorder %s1054_s18, 2 }
  0x26   : > { %s1172_s14 = scalar_select %p24_p8, %s1050_s17, %s26_s26  }
  0x27   : > { %p35_p5 = por %p34_p1, %p33_p9  ;;  %s173_s15 = sand.u32 1, %s1050_s17  }
  0x28   : > { %s871_s22 = smul.u32 3, %s173_s15  ;;  %s991_s8 = scalar_lea.hbm %s1412_s0, 96 }
  0x29   : > { %s872_s28 = smul.u32 48, %s1054_s18  ;;  %p1176_p10 = pnand %p889_p4, %p35_p5 }
  0x2a   : > { %s177_s26 = scalar_lea.vmem [#allocation2], %s871_s22  ;;  %s174_s18 = scalar_lea.sflag [#allocation3], %s173_s15 }
  0x2b   : > { %s1183_s23 = scalar_lea.hbm %s1412_s0, %s872_s28  ;;  %s185_s27 = sshll.u32 %s177_s26, 4  ;;  %s1185_s27 = int_to_ptr.vmem [resolvable:$true] %s185_s27 }
  0x2c   : > { %s986_s5 = scalar_lea.hbm %s1183_s23, 48  ;;  %p988_p11 = pneg %p1176_p10 }
  0x2d   : > { %p987_p7 = scmp.ne.s32.totalorder %s1183_s23, %s986_s5  ;;  %p992_p0 = scmp.lt.u32.totalorder %s1183_s23, %s1412_s0 }
  0x2e   : > { %p993_p2 = scmp.lt.u32.totalorder %s991_s8, %s986_s5  ;;  %p995_p6 = scmp.lt.u32.totalorder %s986_s5, %s1183_s23 }
  0x2f   : > { %p989_p12 = pnand %p988_p11, %p987_p7 }
  0x30   : > { %p994_p3 = por %p993_p2, %p992_p0 }
  0x31   : > { %p990_p13 = pneg %p989_p12 }
  0x32   : > { %p996_p8 = por %p995_p6, %p994_p3 }
  0x34   : > { %p997_p9 = pnand %p996_p8, %p990_p13 }
  0x36   : > { %1000 = shalt.err (!%p997_p9)
}
  0x37   : > { %s1001_s11 = scalar_lea.vmem %s1185_s27, 48  ;;  %s1059_s12 = smov [#allocation2]  }
  0x38   : > { %p1002_p1 = scmp.ne.s32.totalorder %s1185_s27, %s1001_s11  ;;  %s1006_s13 = sshll.u32 %s1059_s12, 4  ;;  %s1007_s13 = int_to_ptr.vmem [resolvable:$false] %s1006_s13 }
  0x39   : > { %s1008_s15 = scalar_lea.vmem %s1007_s13, 96  ;;  %p1009_p7 = scmp.lt.s32.totalorder %s1185_s27, %s1007_s13 }
  0x3a   : > { %p1004_p4 = pnand %p1002_p1, %p988_p11  ;;  %p1010_p12 = scmp.lt.s32.totalorder %s1008_s15, %s1001_s11 }
  0x3c   : > { %p1005_p5 = pneg %p1004_p4  ;;  %p1011_p0 = por %p1010_p12, %p1009_p7 }
  0x3e   : > { %p1012_p2 = pnand %p1011_p0, %p1005_p5 }
  0x40   : > { %1015 = shalt.err (!%p1012_p2)
}
  0x41   : > { %887 = dma.hbm_to_vmem [thread:$0]  (!%p1176_p10), %s1183_s23, 48, %s1185_s27, %s174_s18  }
  0x42   : > { %p1424_p13 = scmp.ne.s32.totalorder %s1421_s21, 0 }
  0x43   : > { %s196_s22 = sand.u32 (!%p1424_p13), 1, %s1046_s16   ;;  %p1425_p11 = scmp.ne.s32.totalorder (!%p1424_p13), %s1420_s20, 0 }
  0x44   : > { %194 = sbr.rel (%p1424_p13) target bundleno = 725 (0x2d5), region = 32  ;;  %s197_s30 = scalar_lea.sflag (!%p1424_p13), [#allocation3], %s196_s22 }
  0x45   : > { %s1215_s28 = smul.u32 (!%p1424_p13), 3, %s196_s22 }
  0x47   : > { %s200_s24 = scalar_lea.vmem (!%p1424_p13), [#allocation2], %s1215_s28 }
  0x4b   : > { %1033 = dma.done.wait (%p1425_p11), %s197_s30, 48  }
  0x4c   : > { %1035 = vsyncadd (%p1425_p11), %s197_s30, 4294967248  ;;  %p1426_p3 = scmp.eq.s32.totalorder %s1121_s19, 0 }
  0x4e   : > { %1037 = dma.done.wait (%p1426_p3), [#allocation5], 256   ;;  %p1427_p10 = pmov %p1426_p3 }
  0x4f   : > { %v1060_v0 = vmov 1   ;;  %v1061_v1 = vmov 2   ;;  %v245_v2 = vld [vmem:[#allocation4] sm:$0xff]  ;;  %v246_v3 = vld [vmem:[#allocation4 + $0x8] sm:$0xff]  ;;  %v1062_v4 = vmov 3   ;;  %v1063_v5 = vmov 4  }
  0x50   : > { %1039 = vsyncadd (%p1427_p10), [#allocation5], 4294967040  ;;  %943 = vset.pattern.permute.xlu0 %v1060_v0  ;;  %944 = vset.pattern.permute.xlu1 %v1061_v1  ;;  %v1064_v6 = vmov 5   ;;  %v1065_v7 = vmov 6   ;;  %v1066_v8 = vmov 7   ;;  %v1067_v9 = vmov 0  }
  0x51   : > { %286 = vperm.xlu0 %943, %v245_v2   ;;  %335 = vperm.xlu1 %944, %v245_v2   ;;  %v1068_v10 = vmov 8   ;;  %v258_v11 = vlaneseq  ;;  %v244_v15 = vld [vmem:[%s200_s24] sm:$0x7]  ;;  %s1069_s20 = smov 127   ;;  %s1070_s21 = smov 126   ;;  %vm317_vm0 = vcmask 1039360  }
  0x52   : > { %s1071_s29 = smov 110   ;;  %s1072_s23 = smov 109   ;;  %vm366_vm1 = vcmask 1031168   ;;  %vm415_vm2 = vcmask 900096   ;;  %vm464_vm3 = vcmask 891904   ;;  %vm513_vm4 = vcmask 883712  }
  0x53   : > { %v1226_v12 = vshrl.u32 %v258_v11, 7  ;;  %s1073_s26 = smov 108   ;;  %s1074_s27 = smov 92   ;;  %vm562_vm5 = vcmask 752640   ;;  %vm611_vm6 = vcmask 744448   ;;  %vm660_vm7 = vcmask 736256  }
  0x54   : > { %s1075_s18 = smov 91   ;;  %s1076_s5 = smov 90   ;;  %vm701_vm8 = vcmask 261120   ;;  %vm741_vm9 = vcmask 7168  }
  0x55   : > { %290 = vperm.xlu0 %943, %v246_v3   ;;  %339 = vperm.xlu1 %944, %v246_v3   ;;  %v260_v13 = vsub.s32 0, %v1226_v12  ;;  %v264_v14 = vsub.s32 1, %v1226_v12  ;;  %v268_v18 = vsub.s32 2, %v1226_v12  ;;  %p234_p6 = scmp.lt.s32.totalorder %s1121_s19, 1 }
  0x57   : > { %v1234_v16 = vrot.slane %v244_v15, %v260_v13  ;;  %v1238_v17 = vrot.slane %v244_v15, %v264_v14  ;;  %v1243_v20 = vrot.slane %v244_v15, %v268_v18  ;;  %s1433_s19 = smov (!%p234_p6, %s1121_s19), 1 }
  0x58   : > { %s869_s8 = sshll.u32 %s1433_s19, 4 }
  0x59   : > { %945 = vset.pattern.permute.xlu0 %v1062_v4  ;;  %946 = vset.pattern.permute.xlu1 %v1062_v4  ;;  %s238_s11 = scalar_lea.vmem %s1415_s3, %s869_s8  ;;  %s243_s15 = scalar_lea.vmem %s1416_s4, %s869_s8 }
  0x5a   : > { %384 = vperm.xlu0 %945, %v245_v2   ;;  %388 = vperm.xlu1 %946, %v246_v3  }
  0x5e   : > { %947 = vset.pattern.permute.xlu1 %v1063_v5  ;;  %948 = vset.pattern.permute.xlu0 %v1063_v5 }
  0x5f   : > { %433 = vperm.xlu1 %947, %v245_v2   ;;  %437 = vperm.xlu0 %948, %v246_v3  }
  0x63   : > { %949 = vset.pattern.permute.xlu1 %v1064_v6  ;;  %950 = vset.pattern.permute.xlu0 %v1065_v7 }
  0x64   : > { %482 = vperm.xlu1 %949, %v245_v2   ;;  %531 = vperm.xlu0 %950, %v245_v2  }
  0x68   : > { %486 = vperm.xlu1 %949, %v246_v3   ;;  %953 = vset.pattern.permute.xlu0 %v1066_v8 }
  0x69   : > { %584 = vperm.xlu0 %953, %v246_v3  }
  0x6c   : > { %951 = vset.pattern.permute.xlu1 %v1065_v7 }
  0x6d   : > { %535 = vperm.xlu1 %951, %v246_v3   ;;  %955 = vset.pattern.permute.xlu0 %v1067_v9 }
  0x6e   : > { %249 = vperm.xlu0 %955, %v245_v2  }
  0x71   : > { %952 = vset.pattern.permute.xlu1 %v1066_v8 }
  0x72   : > { %580 = vperm.xlu1 %952, %v245_v2   ;;  %957 = vset.pattern.permute.xlu0 %v1068_v10 }
  0x76   : > { %954 = vset.pattern.permute.xlu1 %v1068_v10 }
  0x77   : > { %629 = vperm.xlu1 %954, %v245_v2  }
  0x7b   : > { %633 = vperm.xlu1 %954, %v246_v3  }
  0x7f   : > { %956 = vset.pattern.permute.xlu1 %v1067_v9 }
  0x80   : > { %254 = vperm.xlu1 %956, %v246_v3  }
  0xd0   : > { %v287_v19 = vpop.permute.xlu0 %286  ;;  %v336_v26 = vpop.permute.xlu1 %335 }
  0xd1   : > { %v293_v21 = vmul.f32 %v287_v19, %v1234_v16  ;;  %v294_v22 = vmul.f32 %v287_v19, %v1238_v17  ;;  %v295_v24 = vmul.f32 %v287_v19, %v1243_v20  ;;  %v342_v29 = vmul.f32 %v336_v26, %v1234_v16 }
  0xd2   : > { %v343_v30 = vmul.f32 %v336_v26, %v1238_v17  ;;  %v344_v32 = vmul.f32 %v336_v26, %v1243_v20 }
  0xd3   : > { %307 = vrot.lane.b32.xlu0 %v294_v22, %s1069_s20  ;;  %305 = vrot.lane.b32.xlu1 %v293_v21, %s1069_s20 }
  0xd4   : > { %v291_v23 = vpop.permute.xlu0 %290  ;;  %v340_v31 = vpop.permute.xlu1 %339 }
  0xd5   : > { %v296_v25 = vmul.f32 %v291_v23, %v1234_v16  ;;  %v297_v27 = vmul.f32 %v291_v23, %v1238_v17  ;;  %v298_v28 = vmul.f32 %v291_v23, %v1243_v20  ;;  %v345_v33 = vmul.f32 %v340_v31, %v1234_v16 }
  0xd6   : > { %v346_v35 = vmul.f32 %v340_v31, %v1238_v17  ;;  %v347_v36 = vmul.f32 %v340_v31, %v1243_v20 }
  0xd7   : > { %311 = vrot.lane.b32.xlu0 %v296_v25, %s1069_s20  ;;  %309 = vrot.lane.b32.xlu1 %v295_v24, %s1069_s20 }
  0xd9   : > { %v385_v34 = vpop.permute.xlu0 %384  ;;  %v389_v39 = vpop.permute.xlu1 %388 }
  0xda   : > { %v391_v37 = vmul.f32 %v385_v34, %v1234_v16  ;;  %v392_v38 = vmul.f32 %v385_v34, %v1238_v17  ;;  %v394_v40 = vmul.f32 %v389_v39, %v1234_v16  ;;  %v393_v41 = vmul.f32 %v385_v34, %v1243_v20 }
  0xdb   : > { %315 = vrot.lane.b32.xlu0 %v298_v28, %s1069_s20  ;;  %313 = vrot.lane.b32.xlu1 %v297_v27, %s1069_s20  ;;  %v395_v43 = vmul.f32 %v389_v39, %v1238_v17  ;;  %v396_v44 = vmul.f32 %v389_v39, %v1243_v20 }
  0xde   : > { %v434_v42 = vpop.permute.xlu1 %433  ;;  %v438_v47 = vpop.permute.xlu0 %437 }
  0xdf   : > { %356 = vrot.lane.b32.xlu0 %v343_v30, %s1070_s21  ;;  %354 = vrot.lane.b32.xlu1 %v342_v29, %s1070_s21  ;;  %v440_v45 = vmul.f32 %v434_v42, %v1234_v16  ;;  %v441_v46 = vmul.f32 %v434_v42, %v1238_v17  ;;  %v443_v48 = vmul.f32 %v438_v47, %v1234_v16 }
  0xe0   : > { %v442_v49 = vmul.f32 %v434_v42, %v1243_v20  ;;  %v444_v51 = vmul.f32 %v438_v47, %v1238_v17  ;;  %v445_v52 = vmul.f32 %v438_v47, %v1243_v20 }
  0xe3   : > { %360 = vrot.lane.b32.xlu0 %v345_v33, %s1070_s21  ;;  %358 = vrot.lane.b32.xlu1 %v344_v32, %s1070_s21  ;;  %v483_v50 = vpop.permute.xlu1 %482  ;;  %v532_v58 = vpop.permute.xlu0 %531 }
  0xe4   : > { %v489_v53 = vmul.f32 %v483_v50, %v1234_v16  ;;  %v490_v54 = vmul.f32 %v483_v50, %v1238_v17  ;;  %v491_v56 = vmul.f32 %v483_v50, %v1243_v20  ;;  %v538_v61 = vmul.f32 %v532_v58, %v1234_v16 }
  0xe5   : > { %v539_v62 = vmul.f32 %v532_v58, %v1238_v17  ;;  %v540_v1 = vmul.f32 %v532_v58, %v1243_v20 }
  0xe7   : > { %364 = vrot.lane.b32.xlu0 %v347_v36, %s1070_s21  ;;  %362 = vrot.lane.b32.xlu1 %v346_v35, %s1070_s21  ;;  %v487_v55 = vpop.permute.xlu1 %486 }
  0xe8   : > { %v492_v57 = vmul.f32 %v487_v55, %v1234_v16  ;;  %v493_v59 = vmul.f32 %v487_v55, %v1238_v17  ;;  %v494_v60 = vmul.f32 %v487_v55, %v1243_v20  ;;  %v585_v7 = vpop.permute.xlu0 %584 }
  0xe9   : > { %v590_v8 = vmul.f32 %v585_v7, %v1234_v16  ;;  %v591_v11 = vmul.f32 %v585_v7, %v1238_v17  ;;  %v592_v15 = vmul.f32 %v585_v7, %v1243_v20 }
  0xeb   : > { %405 = vrot.lane.b32.xlu0 %v392_v38, %s1071_s29  ;;  %403 = vrot.lane.b32.xlu1 %v391_v37, %s1071_s29 }
  0xec   : > { %v536_v63 = vpop.permute.xlu1 %535 }
  0xed   : > { %v541_v0 = vmul.f32 %v536_v63, %v1234_v16  ;;  %v542_v3 = vmul.f32 %v536_v63, %v1238_v17  ;;  %v543_v4 = vmul.f32 %v536_v63, %v1243_v20  ;;  %v250_v28 = vpop.permute.xlu0 %249 }
  0xee   : > { %v273_v29 = vmul.f32 %v1234_v16, %v250_v28  ;;  %v275_v34 = vmul.f32 %v1243_v20, %v250_v28  ;;  %v274_v35 = vmul.f32 %v1238_v17, %v250_v28 }
  0xef   : > { %409 = vrot.lane.b32.xlu0 %v394_v40, %s1071_s29  ;;  %407 = vrot.lane.b32.xlu1 %v393_v41, %s1071_s29 }
  0xf1   : > { %v581_v2 = vpop.permute.xlu1 %580 }
  0xf2   : > { %v587_v5 = vmul.f32 %v581_v2, %v1234_v16  ;;  %v588_v6 = vmul.f32 %v581_v2, %v1238_v17  ;;  %v589_v9 = vmul.f32 %v581_v2, %v1243_v20 }
  0xf3   : > { %413 = vrot.lane.b32.xlu0 %v396_v44, %s1071_s29  ;;  %411 = vrot.lane.b32.xlu1 %v395_v43, %s1071_s29 }
  0xf6   : > { %v630_v10 = vpop.permute.xlu1 %629 }
  0xf7   : > { %454 = vrot.lane.b32.xlu0 %v441_v46, %s1072_s23  ;;  %452 = vrot.lane.b32.xlu1 %v440_v45, %s1072_s23  ;;  %v636_v19 = vmul.f32 %v630_v10, %v1234_v16  ;;  %v637_v21 = vmul.f32 %v630_v10, %v1238_v17  ;;  %v638_v23 = vmul.f32 %v630_v10, %v1243_v20 }
  0xfa   : > { %v634_v22 = vpop.permute.xlu1 %633 }
  0xfb   : > { %458 = vrot.lane.b32.xlu0 %v443_v48, %s1072_s23  ;;  %456 = vrot.lane.b32.xlu1 %v442_v49, %s1072_s23  ;;  %v639_v24 = vmul.f32 %v634_v22, %v1234_v16  ;;  %v640_v25 = vmul.f32 %v634_v22, %v1238_v17  ;;  %v641_v26 = vmul.f32 %v634_v22, %v1243_v20 }
  0xff   : > { %462 = vrot.lane.b32.xlu0 %v445_v52, %s1072_s23  ;;  %460 = vrot.lane.b32.xlu1 %v444_v51, %s1072_s23  ;;  %v255_v27 = vpop.permute.xlu1 %254 }
 0x100   : > { %v278_v41 = vmul.f32 %v1243_v20, %v255_v27  ;;  %v276_v42 = vmul.f32 %v1234_v16, %v255_v27  ;;  %v277_v43 = vmul.f32 %v1238_v17, %v255_v27 }
 0x103   : > { %503 = vrot.lane.b32.xlu0 %v490_v54, %s1073_s26  ;;  %501 = vrot.lane.b32.xlu1 %v489_v53, %s1073_s26 }
 0x107   : > { %507 = vrot.lane.b32.xlu0 %v492_v57, %s1073_s26  ;;  %505 = vrot.lane.b32.xlu1 %v491_v56, %s1073_s26 }
 0x10b   : > { %511 = vrot.lane.b32.xlu0 %v494_v60, %s1073_s26  ;;  %509 = vrot.lane.b32.xlu1 %v493_v59, %s1073_s26 }
 0x10f   : > { %552 = vrot.lane.b32.xlu0 %v539_v62, %s1074_s27  ;;  %550 = vrot.lane.b32.xlu1 %v538_v61, %s1074_s27 }
 0x113   : > { %556 = vrot.lane.b32.xlu0 %v541_v0, %s1074_s27  ;;  %554 = vrot.lane.b32.xlu1 %v540_v1, %s1074_s27 }
 0x117   : > { %560 = vrot.lane.b32.xlu0 %v543_v4, %s1074_s27  ;;  %558 = vrot.lane.b32.xlu1 %v542_v3, %s1074_s27 }
 0x11b   : > { %601 = vrot.lane.b32.xlu0 %v588_v6, %s1075_s18  ;;  %599 = vrot.lane.b32.xlu1 %v587_v5, %s1075_s18 }
 0x11f   : > { %605 = vrot.lane.b32.xlu0 %v590_v8, %s1075_s18  ;;  %603 = vrot.lane.b32.xlu1 %v589_v9, %s1075_s18 }
 0x123   : > { %609 = vrot.lane.b32.xlu0 %v592_v15, %s1075_s18  ;;  %607 = vrot.lane.b32.xlu1 %v591_v11, %s1075_s18 }
 0x127   : > { %650 = vrot.lane.b32.xlu0 %v637_v21, %s1076_s5  ;;  %648 = vrot.lane.b32.xlu1 %v636_v19, %s1076_s5 }
 0x12b   : > { %654 = vrot.lane.b32.xlu0 %v639_v24, %s1076_s5  ;;  %652 = vrot.lane.b32.xlu1 %v638_v23, %s1076_s5 }
 0x12f   : > { %658 = vrot.lane.b32.xlu0 %v641_v26, %s1076_s5  ;;  %656 = vrot.lane.b32.xlu1 %v640_v25, %s1076_s5 }
 0x145   : > { %v308_v30 = vpop.permute.xlu0 %307  ;;  %v306_v31 = vpop.permute.xlu1 %305 }
 0x146   : > { %v318_v32 = vsel %vm317_vm0, %v306_v31, %v308_v30 }
 0x147   : > { %v328_v33 = vadd.f32 %v318_v32, %v273_v29  ;;  %v677_v29 = vld [vmem:[%s1414_s2] sm:$0x7] }
 0x149   : > { %v312_v36 = vpop.permute.xlu0 %311  ;;  %v310_v37 = vpop.permute.xlu1 %309 }
 0x14a   : > { %v319_v38 = vsel %vm317_vm0, %v308_v30, %v310_v37  ;;  %v1298_v39 = vadd.f32 %v310_v37, %v275_v34  ;;  %v1323_v34 = vrot.slane %v677_v29, %v260_v13 }
 0x14b   : > { %v329_v40 = vadd.f32 %v319_v38, %v274_v35  ;;  %v1327_v35 = vrot.slane %v677_v29, %v264_v14 }
 0x14d   : > { %v316_v44 = vpop.permute.xlu0 %315  ;;  %v314_v45 = vpop.permute.xlu1 %313 }
 0x14e   : > { %v333_v46 = vadd.f32 %v316_v44, %v278_v41  ;;  %v320_v47 = vsel %vm317_vm0, %v312_v36, %v314_v45  ;;  %v321_v48 = vsel %vm317_vm0, %v314_v45, %v316_v44  ;;  %v1335_v44 = vrot.slane %v677_v29, %v268_v18 }
 0x14f   : > { %v331_v49 = vadd.f32 %v320_v47, %v276_v42  ;;  %v332_v50 = vadd.f32 %v321_v48, %v277_v43 }
 0x151   : > { %v357_v51 = vpop.permute.xlu0 %356  ;;  %v355_v52 = vpop.permute.xlu1 %354 }
 0x152   : > { %v367_v53 = vsel %vm366_vm1, %v355_v52, %v357_v51 }
 0x153   : > { %v377_v54 = vadd.f32 %v367_v53, %v328_v33 }
 0x155   : > { %v361_v20 = vpop.permute.xlu0 %360  ;;  %v359_v55 = vpop.permute.xlu1 %358 }
 0x156   : > { %v368_v16 = vsel %vm366_vm1, %v357_v51, %v359_v55  ;;  %v379_v36 = vadd.f32 %v359_v55, %v1298_v39 }
 0x157   : > { %v378_v17 = vadd.f32 %v368_v16, %v329_v40 }
 0x159   : > { %v365_v56 = vpop.permute.xlu0 %364  ;;  %v363_v57 = vpop.permute.xlu1 %362 }
 0x15a   : > { %v369_v58 = vsel %vm366_vm1, %v361_v20, %v363_v57  ;;  %v370_v30 = vsel %vm366_vm1, %v363_v57, %v365_v56  ;;  %v382_v41 = vadd.f32 %v365_v56, %v333_v46 }
 0x15b   : > { %v380_v59 = vadd.f32 %v369_v58, %v331_v49  ;;  %v381_v42 = vadd.f32 %v370_v30, %v332_v50 }
 0x15d   : > { %v406_v60 = vpop.permute.xlu0 %405  ;;  %v404_v61 = vpop.permute.xlu1 %403 }
 0x15e   : > { %v416_v31 = vsel %vm415_vm2, %v404_v61, %v406_v60 }
 0x15f   : > { %v426_v43 = vadd.f32 %v416_v31, %v377_v54 }
 0x161   : > { %v410_v62 = vpop.permute.xlu0 %409  ;;  %v408_v63 = vpop.permute.xlu1 %407 }
 0x162   : > { %v417_v37 = vsel %vm415_vm2, %v406_v60, %v408_v63  ;;  %v428_v13 = vadd.f32 %v408_v63, %v379_v36 }
 0x163   : > { %v427_v47 = vadd.f32 %v417_v37, %v378_v17 }
 0x165   : > { %v414_v0 = vpop.permute.xlu0 %413  ;;  %v412_v1 = vpop.permute.xlu1 %411 }
 0x166   : > { %v418_v38 = vsel %vm415_vm2, %v410_v62, %v412_v1  ;;  %v419_v45 = vsel %vm415_vm2, %v412_v1, %v414_v0  ;;  %v431_v48 = vadd.f32 %v414_v0, %v382_v41 }
 0x167   : > { %v429_v49 = vadd.f32 %v418_v38, %v380_v59  ;;  %v430_v54 = vadd.f32 %v419_v45, %v381_v42 }
 0x169   : > { %v455_v2 = vpop.permute.xlu0 %454  ;;  %v453_v3 = vpop.permute.xlu1 %452 }
 0x16a   : > { %v465_v40 = vsel %vm464_vm3, %v453_v3, %v455_v2 }
 0x16b   : > { %v475_v51 = vadd.f32 %v465_v40, %v426_v43 }
 0x16d   : > { %v459_v4 = vpop.permute.xlu0 %458  ;;  %v457_v5 = vpop.permute.xlu1 %456 }
 0x16e   : > { %v466_v14 = vsel %vm464_vm3, %v455_v2, %v457_v5  ;;  %v477_v46 = vadd.f32 %v457_v5, %v428_v13 }
 0x16f   : > { %v476_v20 = vadd.f32 %v466_v14, %v427_v47 }
 0x171   : > { %v463_v6 = vpop.permute.xlu0 %462  ;;  %v461_v7 = vpop.permute.xlu1 %460 }
 0x172   : > { %v467_v50 = vsel %vm464_vm3, %v459_v4, %v461_v7  ;;  %v480_v55 = vadd.f32 %v463_v6, %v431_v48  ;;  %v468_v56 = vsel %vm464_vm3, %v461_v7, %v463_v6 }
 0x173   : > { %v478_v59 = vadd.f32 %v467_v50, %v429_v49  ;;  %v479_v5 = vadd.f32 %v468_v56, %v430_v54 }
 0x175   : > { %v504_v8 = vpop.permute.xlu0 %503  ;;  %v502_v9 = vpop.permute.xlu1 %501 }
 0x176   : > { %v514_v39 = vsel %vm513_vm4, %v502_v9, %v504_v8 }
 0x177   : > { %v524_v16 = vadd.f32 %v514_v39, %v475_v51 }
 0x179   : > { %v508_v10 = vpop.permute.xlu0 %507  ;;  %v506_v11 = vpop.permute.xlu1 %505 }
 0x17a   : > { %v515_v12 = vsel %vm513_vm4, %v504_v8, %v506_v11  ;;  %v526_v57 = vadd.f32 %v506_v11, %v477_v46 }
 0x17b   : > { %v525_v60 = vadd.f32 %v515_v12, %v476_v20 }
 0x17d   : > { %v1308_v15 = vpop.permute.xlu0 %511  ;;  %v510_v19 = vpop.permute.xlu1 %509 }
 0x17e   : > { %v516_v61 = vsel %vm513_vm4, %v508_v10, %v510_v19  ;;  %v517_v1 = vsel %vm513_vm4, %v510_v19, %v1308_v15  ;;  %v529_v6 = vadd.f32 %v1308_v15, %v480_v55 }
 0x17f   : > { %v527_v9 = vadd.f32 %v516_v61, %v478_v59 }
 0x181   : > { %v553_v21 = vpop.permute.xlu0 %552  ;;  %v551_v22 = vpop.permute.xlu1 %550 }
 0x182   : > { %v563_v18 = vsel %vm562_vm5, %v551_v22, %v553_v21 }
 0x183   : > { %v573_v62 = vadd.f32 %v563_v18, %v524_v16 }
 0x185   : > { %v1310_v23 = vpop.permute.xlu0 %556  ;;  %v555_v24 = vpop.permute.xlu1 %554 }
 0x186   : > { %v564_v17 = vsel %vm562_vm5, %v553_v21, %v555_v24  ;;  %v575_v2 = vadd.f32 %v555_v24, %v526_v57  ;;  %v528_v21 = vadd.f32 %v517_v1, %v479_v5 }
 0x187   : > { %v574_v7 = vadd.f32 %v564_v17, %v525_v60 }
 0x189   : > { %v1312_v25 = vpop.permute.xlu0 %560  ;;  %v1314_v26 = vpop.permute.xlu1 %558 }
 0x18a   : > { %v565_v10 = vsel %vm562_vm5, %v1310_v23, %v1314_v26  ;;  %v566_v11 = vsel %vm562_vm5, %v1314_v26, %v1312_v25  ;;  %v578_v22 = vadd.f32 %v1312_v25, %v529_v6 }
 0x18b   : > { %v576_v23 = vadd.f32 %v565_v10, %v527_v9  ;;  %v577_v37 = vadd.f32 %v566_v11, %v528_v21 }
 0x18d   : > { %v602_v27 = vpop.permute.xlu0 %601  ;;  %v600_v28 = vpop.permute.xlu1 %599 }
 0x18e   : > { %v612_v58 = vsel %vm611_vm6, %v600_v28, %v602_v27 }
 0x18f   : > { %v622_v8 = vadd.f32 %v612_v58, %v573_v62 }
 0x191   : > { %v606_v32 = vpop.permute.xlu0 %605  ;;  %v604_v33 = vpop.permute.xlu1 %603 }
 0x192   : > { %v613_v3 = vsel %vm611_vm6, %v602_v27, %v604_v33  ;;  %v624_v19 = vadd.f32 %v604_v33, %v575_v2 }
 0x193   : > { %v623_v24 = vadd.f32 %v613_v3, %v574_v7 }
 0x195   : > { %v610_v52 = vpop.permute.xlu0 %609  ;;  %v608_v53 = vpop.permute.xlu1 %607 }
 0x196   : > { %v614_v15 = vsel %vm611_vm6, %v606_v32, %v608_v53  ;;  %v615_v30 = vsel %vm611_vm6, %v608_v53, %v610_v52  ;;  %v627_v40 = vadd.f32 %v610_v52, %v578_v22 }
 0x197   : > { %v625_v33 = vadd.f32 %v614_v15, %v576_v23  ;;  %v626_v25 = vadd.f32 %v615_v30, %v577_v37 }
 0x199   : > { %v651_v63 = vpop.permute.xlu0 %650  ;;  %v649_v0 = vpop.permute.xlu1 %648 }
 0x19a   : > { %v661_v4 = vsel %vm660_vm7, %v649_v0, %v651_v63 }
 0x19b   : > { %v671_v27 = vadd.f32 %v661_v4, %v622_v8 }
 0x19d   : > { %v655_v28 = vpop.permute.xlu0 %654  ;;  %v653_v29 = vpop.permute.xlu1 %652  ;;  %v694_v41 = vmul.f32 %v1323_v34, %v671_v27 }
 0x19e   : > { %v662_v31 = vsel %vm660_vm7, %v651_v63, %v653_v29  ;;  %v673_v36 = vadd.f32 %v653_v29, %v624_v19 }
 0x19f   : > { %v672_v38 = vadd.f32 %v662_v31, %v623_v24 }
 0x1a0   : > { %v696_v26 = vmul.f32 %v1335_v44, %v673_v36 }
 0x1a1   : > { %v695_v42 = vmul.f32 %v1327_v35, %v672_v38  ;;  %v659_v43 = vpop.permute.xlu0 %658  ;;  %v657_v32 = vpop.permute.xlu1 %656 }
 0x1a2   : > { %v676_v13 = vadd.f32 %v659_v43, %v627_v40  ;;  %v663_v45 = vsel %vm660_vm7, %v655_v28, %v657_v32  ;;  %v664_v14 = vsel %vm660_vm7, %v657_v32, %v659_v43  ;;  %v702_v51 = vsel %vm701_vm8, %v696_v26, 0.0 }
 0x1a3   : > { %v674_v39 = vadd.f32 %v663_v45, %v625_v33  ;;  %v675_v47 = vadd.f32 %v664_v14, %v626_v25  ;;  %v700_v48 = vadd.f32 %v695_v42, %v694_v41 }
 0x1a4   : > { %v699_v49 = vmul.f32 %v1335_v44, %v676_v13 }
 0x1a5   : > { %v697_v52 = vmul.f32 %v1323_v34, %v674_v39  ;;  %v698_v53 = vmul.f32 %v1327_v35, %v675_v47  ;;  %v703_v46 = vadd.f32 %v702_v51, %v700_v48 }
 0x1a6   : > { %v707_v12 = vsel %vm701_vm8, %v699_v49, 0.0 }
 0x1a7   : > { %704 = vadd.xlane.f32.xlu1 %v703_v46  ;;  %v706_v50 = vadd.f32 %v698_v53, %v697_v52 }
 0x1a9   : > { %v708_v18 = vadd.f32 %v707_v12, %v706_v50 }
 0x1ab   : > { %709 = vadd.xlane.f32.xlu0 %v708_v18 }
 0x234   : > { %v705_v54 = vpop.xlane.xlu1 %704 }
 0x235   : > { %v711_v20 = vmul.f32 0.00390625, %v705_v54 }
 0x237   : > { %v713_v55 = vsub.f32 %v671_v27, %v711_v20  ;;  %v714_v16 = vsub.f32 %v672_v38, %v711_v20  ;;  %v715_v56 = vsub.f32 %v673_v36, %v711_v20  ;;  %742 = vst.msk [vmem:[%s238_s11] sm:$0xff] %vm741_vm9, %v711_v20 }
 0x238   : > { %v710_v57 = vpop.xlane.xlu0 %709 }
 0x239   : > { %v712_v17 = vmul.f32 0.00390625, %v710_v57  ;;  %v719_v58 = vmul.f32 %v713_v55, %v1323_v34  ;;  %v720_v59 = vmul.f32 %v714_v16, %v1327_v35  ;;  %v721_v60 = vmul.f32 %v715_v56, %v1335_v44 }
 0x23b   : > { %v725_v61 = vmul.f32 %v719_v58, %v719_v58  ;;  %v726_v62 = vmul.f32 %v720_v59, %v720_v59  ;;  %v727_v63 = vmul.f32 %v721_v60, %v721_v60  ;;  %v716_v0 = vsub.f32 %v674_v39, %v712_v17  ;;  %743 = vst.msk [vmem:[%s238_s11 + $0x8] sm:$0xff] %vm741_vm9, %v712_v17 }
 0x23c   : > { %v717_v1 = vsub.f32 %v675_v47, %v712_v17  ;;  %v718_v2 = vsub.f32 %v676_v13, %v712_v17 }
 0x23d   : > { %v731_v3 = vadd.f32 %v726_v62, %v725_v61  ;;  %v732_v4 = vsel %vm701_vm8, %v727_v63, 0.0  ;;  %v722_v5 = vmul.f32 %v716_v0, %v1323_v34 }
 0x23e   : > { %v723_v6 = vmul.f32 %v717_v1, %v1327_v35  ;;  %v724_v7 = vmul.f32 %v718_v2, %v1335_v44 }
 0x23f   : > { %v733_v8 = vadd.f32 %v732_v4, %v731_v3  ;;  %v728_v9 = vmul.f32 %v722_v5, %v722_v5 }
 0x240   : > { %v729_v10 = vmul.f32 %v723_v6, %v723_v6  ;;  %v730_v11 = vmul.f32 %v724_v7, %v724_v7 }
 0x241   : > { %734 = vadd.xlane.f32.xlu0 %v733_v8 }
 0x242   : > { %v736_v19 = vadd.f32 %v729_v10, %v728_v9  ;;  %v737_v21 = vsel %vm701_vm8, %v730_v11, 0.0 }
 0x244   : > { %v738_v22 = vadd.f32 %v737_v21, %v736_v19 }
 0x246   : > { %739 = vadd.xlane.f32.xlu1 %v738_v22 }
 0x2ce   : > { %v735_v34 = vpop.xlane.xlu0 %734 }
 0x2cf   : > { %744 = vst.msk [vmem:[%s243_s15] sm:$0xff] %vm741_vm9, %v735_v34 }
 0x2d3   : > { %v740_v35 = vpop.xlane.xlu1 %739 }
 0x2d4   : > { %745 = vst.msk [vmem:[%s243_s15 + $0x8] sm:$0xff] %vm741_vm9, %v740_v35 }
 0x2d5 PF: > { %p16_p8 = scmp.ge.s32.totalorder %s1146_s25, 4   ;;  %s1428_s15 = smov %s1046_s16 }
 0x2d6   : > { %s1429_s16 = smov %s1050_s17  ;;  %s1430_s17 = smov %s1172_s14 }
 0x2d7   : > { %s1431_s18 = smov %s1146_s25  ;;  %18 = sbr.rel (!%p16_p8) target bundleno = 4 (0x4), region = 88 }
 0x2de   :  { %783 = vsyncpa [#allocation3], 1 }
 0x2df   :  { %785 = vsyncpa [#allocation3 + $0x1], 1 }
 0x2e0   :  { %786 = vsyncpa [#allocation5], 1 }

</bundles_post_ra>
